<compile_context>
chip_gen: v7x
topology: tpu7x:2x2x1
jax: 0.10.0
libtpu: 0.0.40
codegen_flags: <defaults>
</compile_context>

<pallas_src>
import math

import jax
import jax.numpy as jnp
import numpy as np
from jax.experimental import pallas as pl
from jax.experimental.pallas import tpu as pltpu

D_MODEL = 32
N_HEADS = 4
D_KEY = D_MODEL // N_HEADS


def mha_kernel(q_ref, k_ref, v_ref, wqkv_ref, bqkv_ref, wo_ref, bo_ref, out_ref):
    """One grid step processes the whole (tiny) problem.

    q/k/v refs : (B, L, D)
    wqkv       : (3, H, D, Dk)  per-head Q/K/V weights (x @ W form), Q pre-scaled
    bqkv       : (3, H, 1, Dk)  per-head Q/K/V biases (Q bias pre-scaled)
    wo         : (H, Dk, D)     output projection split per head
    bo         : (1, D)
    out        : (B, Lq, D + H*Lk) fused slab:
                   [..., :D]  = attention output
                   [..., D:]  = attention probs, lane-dense (wrapper untangles)
    """
    B, Lq, D = q_ref.shape
    Lk = k_ref.shape[1]

    # Flatten batch into the M dim for the projections (one MXU M=B*L).
    q2 = q_ref[...].reshape(B * Lq, D)
    k2 = k_ref[...].reshape(B * Lk, D)
    v2 = v_ref[...].reshape(B * Lk, D)

    # Output-projection accumulator initialised with the output bias.
    acc = jnp.broadcast_to(bo_ref[...], (B * Lq, D))

    probs = []
    for h in range(N_HEADS):  # static unroll over heads
        # Per-head projections: leading-index weight loads, no lane slicing.
        Qh = jnp.dot(q2, wqkv_ref[0, h], preferred_element_type=jnp.float32) + bqkv_ref[0, h]
        Kh = jnp.dot(k2, wqkv_ref[1, h], preferred_element_type=jnp.float32) + bqkv_ref[1, h]
        Vh = jnp.dot(v2, wqkv_ref[2, h], preferred_element_type=jnp.float32) + bqkv_ref[2, h]

        Qh = Qh.reshape(B, Lq, D_KEY)
        Kh = Kh.reshape(B, Lk, D_KEY)
        Vh = Vh.reshape(B, Lk, D_KEY)

        # Scores (1/sqrt(Dk) pre-folded into wq/bq); contraction on last dims,
        # no materialized transpose of Kh.
        s = jnp.einsum("bqd,bkd->bqk", Qh, Kh,
                       preferred_element_type=jnp.float32)
        m = jnp.max(s, axis=-1, keepdims=True)
        e = jnp.exp(s - m)
        p = e * pl.reciprocal(jnp.sum(e, axis=-1, keepdims=True), approx=True)
        probs.append(p)

        Ah = jnp.einsum("bqk,bkd->bqd", p, Vh,
                        preferred_element_type=jnp.float32)
        # Output projection accumulated per head: no concat of A heads.
        acc = acc + jnp.dot(Ah.reshape(B * Lq, D_KEY), wo_ref[h],
                            preferred_element_type=jnp.float32)

    # One fused lane-dense store (width D + H*Lk) for output + attention probs.
    out_ref[...] = jnp.concatenate([acc.reshape(B, Lq, D)] + probs, axis=-1)


def _full_spec(shape):
    return pl.BlockSpec(shape, lambda i, _n=len(shape): (0,) * _n)


@jax.jit
def multi_head_attention(query, key, value, params):
    """params: dict with wq, bq, wk, bk, wv, bv, wo, bo.
    Weights are (d_model, d_model) already transposed to (in, out);
    biases are (1, d_model). Returns (output, attn_probs)."""
    B, Lq, D = query.shape
    Lk = key.shape[1]
    H, Dk = N_HEADS, D_KEY
    scale = 1.0 / math.sqrt(Dk)

    # Host/XLA-side packing (layout plumbing, fused under jit):
    #   * per-head (H, D, Dk) layout so head access is a leading-index load,
    #   * Q/K/V weights & biases stacked -> 2 weight DMAs instead of 6,
    #   * softmax scale folded into the Q projection.
    def per_head_w(w):
        return w.reshape(D, H, Dk).transpose(1, 0, 2)          # (H, D, Dk)

    def per_head_b(b):
        return b.reshape(1, H, Dk).transpose(1, 0, 2)          # (H, 1, Dk)

    wqkv = jnp.stack([per_head_w(params["wq"] * scale),
                      per_head_w(params["wk"]),
                      per_head_w(params["wv"])])                # (3, H, D, Dk)
    bqkv = jnp.stack([per_head_b(params["bq"] * scale),
                      per_head_b(params["bk"]),
                      per_head_b(params["bv"])])                # (3, H, 1, Dk)
    wo_h = params["wo"].reshape(H, Dk, D)                       # (H, Dk, D)
    bo = params["bo"]                                           # (1, D)

    slab = pl.pallas_call(
        mha_kernel,
        out_shape=jax.ShapeDtypeStruct((B, Lq, D + H * Lk), jnp.float32),
        grid_spec=pltpu.PrefetchScalarGridSpec(
            num_scalar_prefetch=0,
            grid=(1,),  # whole problem fits comfortably in VMEM -> one step
            in_specs=[
                _full_spec((B, Lq, D)),
                _full_spec((B, Lk, D)),
                _full_spec((B, Lk, D)),
                _full_spec((3, H, D, Dk)),
                _full_spec((3, H, 1, Dk)),
                _full_spec((H, Dk, D)),
                _full_spec((1, D)),
            ],
            out_specs=_full_spec((B, Lq, D + H * Lk)),
        ),
        compiler_params=pltpu.CompilerParams(
            dimension_semantics=("arbitrary",)),
    )(query, key, value, wqkv, bqkv, wo_h, bo)

    # Layout-only untangle of the fused slab.
    out = slab[..., :D]
    attn = slab[..., D:].reshape(B, Lq, H, Lk).transpose(0, 2, 1, 3)
    return out, attn


def reference_mha(query, key, value, params):
    """Pure-JAX reference mirroring the PyTorch forward (mask=None, eval)."""
    B, Lq, D = query.shape
    Q = query @ params["wq"] + params["bq"][0]
    K = key @ params["wk"] + params["bk"][0]
    V = value @ params["wv"] + params["bv"][0]
    Q = Q.reshape(B, -1, N_HEADS, D_KEY).transpose(0, 2, 1, 3)
    K = K.reshape(B, -1, N_HEADS, D_KEY).transpose(0, 2, 1, 3)
    V = V.reshape(B, -1, N_HEADS, D_KEY).transpose(0, 2, 1, 3)
    s = jnp.einsum("bhqd,bhkd->bhqk", Q, K) / math.sqrt(D_KEY)
    p = jax.nn.softmax(s, axis=-1)
    A = jnp.einsum("bhqk,bhkd->bhqd", p, V)
    A = A.transpose(0, 2, 1, 3).reshape(B, -1, D)
    out = A @ params["wo"] + params["bo"][0]
    return out, p


if __name__ == "__main__":
    B, L = 2, 8
    key0 = jax.random.PRNGKey(0)
    ks = jax.random.split(key0, 11)

    q = jax.random.normal(ks[0], (B, L, D_MODEL), dtype=jnp.float32)
    k = jax.random.normal(ks[1], (B, L, D_MODEL), dtype=jnp.float32)
    v = jax.random.normal(ks[2], (B, L, D_MODEL), dtype=jnp.float32)

    bound = 1.0 / math.sqrt(D_MODEL)   # PyTorch nn.Linear default init range
    def u(kk, shape):
        return jax.random.uniform(kk, shape, jnp.float32, -bound, bound)

    params = {
        "wq": u(ks[3], (D_MODEL, D_MODEL)), "bq": u(ks[4], (1, D_MODEL)),
        "wk": u(ks[5], (D_MODEL, D_MODEL)), "bk": u(ks[6], (1, D_MODEL)),
        "wv": u(ks[7], (D_MODEL, D_MODEL)), "bv": u(ks[8], (1, D_MODEL)),
        "wo": u(ks[9], (D_MODEL, D_MODEL)), "bo": u(ks[10], (1, D_MODEL)),
    }

    out, attn = multi_head_attention(q, k, v, params)
    jax.block_until_ready((out, attn))

    ref_out, ref_attn = reference_mha(q, k, v, params)
    # Tolerance 2e-3 because the softmax denominator uses the EUP approximate
    # reciprocal (pl.reciprocal(approx=True)).
    np.testing.assert_allclose(np.asarray(out), np.asarray(ref_out),
                               rtol=2e-3, atol=2e-3)
    np.testing.assert_allclose(np.asarray(attn), np.asarray(ref_attn),
                               rtol=2e-3, atol=2e-3)

    print("KERNEL_OK")
</pallas_src>

<mosaic_0001>
module attributes {stable_mosaic.version = 11 : i64} {
  func.func @mha_kernel(%arg0: i32, %arg1: memref<2x8x32xf32, #tpu.memory_space<vmem>>, %arg2: memref<2x8x32xf32, #tpu.memory_space<vmem>>, %arg3: memref<2x8x32xf32, #tpu.memory_space<vmem>>, %arg4: memref<3x4x32x8xf32, #tpu.memory_space<vmem>>, %arg5: memref<3x4x1x8xf32, #tpu.memory_space<vmem>>, %arg6: memref<4x8x32xf32, #tpu.memory_space<vmem>>, %arg7: memref<1x32xf32, #tpu.memory_space<vmem>>, %arg8: memref<2x8x64xf32, #tpu.memory_space<vmem>>) attributes {dimension_semantics = [#tpu.dimension_semantics<arbitrary>], iteration_bounds = array<i64: 1>, scalar_prefetch = 0 : i64, scratch_operands = 0 : i64, tpu.core_type = #tpu.core_type<tc>, window_params = [{pipeline_mode = #tpu.pipeline_mode<synchronous>, transform_indices = @transform_0, window_bounds = array<i64: 2, 8, 32>}, {pipeline_mode = #tpu.pipeline_mode<synchronous>, transform_indices = @transform_1, window_bounds = array<i64: 2, 8, 32>}, {pipeline_mode = #tpu.pipeline_mode<synchronous>, transform_indices = @transform_2, window_bounds = array<i64: 2, 8, 32>}, {pipeline_mode = #tpu.pipeline_mode<synchronous>, transform_indices = @transform_3, window_bounds = array<i64: 3, 4, 32, 8>}, {pipeline_mode = #tpu.pipeline_mode<synchronous>, transform_indices = @transform_4, window_bounds = array<i64: 3, 4, 1, 8>}, {pipeline_mode = #tpu.pipeline_mode<synchronous>, transform_indices = @transform_5, window_bounds = array<i64: 4, 8, 32>}, {pipeline_mode = #tpu.pipeline_mode<synchronous>, transform_indices = @transform_6, window_bounds = array<i64: 1, 32>}, {pipeline_mode = #tpu.pipeline_mode<synchronous>, transform_indices = @transform_7, window_bounds = array<i64: 2, 8, 64>}]} {
    %c0 = arith.constant 0 : index
    %c0_0 = arith.constant 0 : index
    %c0_1 = arith.constant 0 : index
    %0 = vector.load %arg1[%c0, %c0_0, %c0_1] : memref<2x8x32xf32, #tpu.memory_space<vmem>>, vector<2x8x32xf32>
    %1 = vector.shape_cast %0 : vector<2x8x32xf32> to vector<16x32xf32>
    %c0_2 = arith.constant 0 : index
    %c0_3 = arith.constant 0 : index
    %c0_4 = arith.constant 0 : index
    %2 = vector.load %arg2[%c0_2, %c0_3, %c0_4] : memref<2x8x32xf32, #tpu.memory_space<vmem>>, vector<2x8x32xf32>
    %3 = vector.shape_cast %2 : vector<2x8x32xf32> to vector<16x32xf32>
    %c0_5 = arith.constant 0 : index
    %c0_6 = arith.constant 0 : index
    %c0_7 = arith.constant 0 : index
    %4 = vector.load %arg3[%c0_5, %c0_6, %c0_7] : memref<2x8x32xf32, #tpu.memory_space<vmem>>, vector<2x8x32xf32>
    %5 = vector.shape_cast %4 : vector<2x8x32xf32> to vector<16x32xf32>
    %c0_8 = arith.constant 0 : index
    %c0_9 = arith.constant 0 : index
    %6 = vector.load %arg7[%c0_8, %c0_9] : memref<1x32xf32, #tpu.memory_space<vmem>>, vector<1x32xf32>
    %7 = vector.shape_cast %6 : vector<1x32xf32> to vector<1x32xf32>
    %8 = vector.broadcast %7 : vector<1x32xf32> to vector<16x32xf32>
    %c0_10 = arith.constant 0 : index
    %c0_11 = arith.constant 0 : index
    %c0_12 = arith.constant 0 : index
    %c0_13 = arith.constant 0 : index
    %9 = vector.load %arg4[%c0_10, %c0_11, %c0_12, %c0_13] : memref<3x4x32x8xf32, #tpu.memory_space<vmem>>, vector<1x1x32x8xf32>
    %10 = vector.shape_cast %9 : vector<1x1x32x8xf32> to vector<32x8xf32>
    %cst = arith.constant dense<0.000000e+00> : vector<16x8xf32>
    %11 = tpu.matmul %1, %10, %cst {dimension_numbers = #tpu.dot_dimension_numbers<[1], [0], [0], [1], [0, 0, 1, 1], [], []>} : vector<16x32xf32>, vector<32x8xf32>, vector<16x8xf32> -> vector<16x8xf32>
    %c0_14 = arith.constant 0 : index
    %c0_15 = arith.constant 0 : index
    %c0_16 = arith.constant 0 : index
    %c0_17 = arith.constant 0 : index
    %12 = vector.load %arg5[%c0_14, %c0_15, %c0_16, %c0_17] : memref<3x4x1x8xf32, #tpu.memory_space<vmem>>, vector<1x1x1x8xf32>
    %13 = vector.shape_cast %12 : vector<1x1x1x8xf32> to vector<1x8xf32>
    %14 = vector.broadcast %13 : vector<1x8xf32> to vector<16x8xf32>
    %15 = arith.addf %11, %14 : vector<16x8xf32>
    %c1 = arith.constant 1 : index
    %c0_18 = arith.constant 0 : index
    %c0_19 = arith.constant 0 : index
    %c0_20 = arith.constant 0 : index
    %16 = vector.load %arg4[%c1, %c0_18, %c0_19, %c0_20] : memref<3x4x32x8xf32, #tpu.memory_space<vmem>>, vector<1x1x32x8xf32>
    %17 = vector.shape_cast %16 : vector<1x1x32x8xf32> to vector<32x8xf32>
    %cst_21 = arith.constant dense<0.000000e+00> : vector<16x8xf32>
    %18 = tpu.matmul %3, %17, %cst_21 {dimension_numbers = #tpu.dot_dimension_numbers<[1], [0], [0], [1], [0, 0, 1, 1], [], []>} : vector<16x32xf32>, vector<32x8xf32>, vector<16x8xf32> -> vector<16x8xf32>
    %c1_22 = arith.constant 1 : index
    %c0_23 = arith.constant 0 : index
    %c0_24 = arith.constant 0 : index
    %c0_25 = arith.constant 0 : index
    %19 = vector.load %arg5[%c1_22, %c0_23, %c0_24, %c0_25] : memref<3x4x1x8xf32, #tpu.memory_space<vmem>>, vector<1x1x1x8xf32>
    %20 = vector.shape_cast %19 : vector<1x1x1x8xf32> to vector<1x8xf32>
    %21 = vector.broadcast %20 : vector<1x8xf32> to vector<16x8xf32>
    %22 = arith.addf %18, %21 : vector<16x8xf32>
    %c2 = arith.constant 2 : index
    %c0_26 = arith.constant 0 : index
    %c0_27 = arith.constant 0 : index
    %c0_28 = arith.constant 0 : index
    %23 = vector.load %arg4[%c2, %c0_26, %c0_27, %c0_28] : memref<3x4x32x8xf32, #tpu.memory_space<vmem>>, vector<1x1x32x8xf32>
    %24 = vector.shape_cast %23 : vector<1x1x32x8xf32> to vector<32x8xf32>
    %cst_29 = arith.constant dense<0.000000e+00> : vector<16x8xf32>
    %25 = tpu.matmul %5, %24, %cst_29 {dimension_numbers = #tpu.dot_dimension_numbers<[1], [0], [0], [1], [0, 0, 1, 1], [], []>} : vector<16x32xf32>, vector<32x8xf32>, vector<16x8xf32> -> vector<16x8xf32>
    %c2_30 = arith.constant 2 : index
    %c0_31 = arith.constant 0 : index
    %c0_32 = arith.constant 0 : index
    %c0_33 = arith.constant 0 : index
    %26 = vector.load %arg5[%c2_30, %c0_31, %c0_32, %c0_33] : memref<3x4x1x8xf32, #tpu.memory_space<vmem>>, vector<1x1x1x8xf32>
    %27 = vector.shape_cast %26 : vector<1x1x1x8xf32> to vector<1x8xf32>
    %28 = vector.broadcast %27 : vector<1x8xf32> to vector<16x8xf32>
    %29 = arith.addf %25, %28 : vector<16x8xf32>
    %30 = vector.shape_cast %15 : vector<16x8xf32> to vector<2x8x8xf32>
    %31 = vector.shape_cast %22 : vector<16x8xf32> to vector<2x8x8xf32>
    %32 = vector.shape_cast %29 : vector<16x8xf32> to vector<2x8x8xf32>
    "tpu.trace_start"() <{level = 10 : i32, message = "bqd,bkd->bqk"}> : () -> ()
    %cst_34 = arith.constant dense<0.000000e+00> : vector<2x8x8xf32>
    %33 = tpu.matmul %30, %31, %cst_34 {dimension_numbers = #tpu.dot_dimension_numbers<[2], [2], [1], [1], [0, 0, 0, 1, 1, 1], [0], [0]>} : vector<2x8x8xf32>, vector<2x8x8xf32>, vector<2x8x8xf32> -> vector<2x8x8xf32>
    "tpu.trace_stop"() : () -> ()
    %cst_35 = arith.constant dense<0xFF800000> : vector<2x8xf32>
    %34 = vector.multi_reduction <maximumf>, %33, %cst_35 [2] : vector<2x8x8xf32> to vector<2x8xf32>
    %35 = vector.shape_cast %34 : vector<2x8xf32> to vector<2x8x1xf32>
    %36 = vector.broadcast %35 : vector<2x8x1xf32> to vector<2x8x8xf32>
    %37 = arith.subf %33, %36 : vector<2x8x8xf32>
    %38 = math.exp %37 : vector<2x8x8xf32>
    %cst_36 = arith.constant dense<0.000000e+00> : vector<2x8xf32>
    %39 = vector.multi_reduction <add>, %38, %cst_36 [2] : vector<2x8x8xf32> to vector<2x8xf32>
    %40 = vector.shape_cast %39 : vector<2x8xf32> to vector<2x8x1xf32>
    %41 = tpu.reciprocal %40 {approx = true} : vector<2x8x1xf32> -> vector<2x8x1xf32>
    %42 = vector.broadcast %41 : vector<2x8x1xf32> to vector<2x8x8xf32>
    %43 = arith.mulf %38, %42 : vector<2x8x8xf32>
    "tpu.trace_start"() <{level = 10 : i32, message = "bqk,bkd->bqd"}> : () -> ()
    %cst_37 = arith.constant dense<0.000000e+00> : vector<2x8x8xf32>
    %44 = tpu.matmul %43, %32, %cst_37 {dimension_numbers = #tpu.dot_dimension_numbers<[2], [1], [1], [2], [0, 0, 0, 1, 1, 2], [0], [0]>} : vector<2x8x8xf32>, vector<2x8x8xf32>, vector<2x8x8xf32> -> vector<2x8x8xf32>
    "tpu.trace_stop"() : () -> ()
    %45 = vector.shape_cast %44 : vector<2x8x8xf32> to vector<16x8xf32>
    %c0_38 = arith.constant 0 : index
    %c0_39 = arith.constant 0 : index
    %c0_40 = arith.constant 0 : index
    %46 = vector.load %arg6[%c0_38, %c0_39, %c0_40] : memref<4x8x32xf32, #tpu.memory_space<vmem>>, vector<1x8x32xf32>
    %47 = vector.shape_cast %46 : vector<1x8x32xf32> to vector<8x32xf32>
    %cst_41 = arith.constant dense<0.000000e+00> : vector<16x32xf32>
    %48 = tpu.matmul %45, %47, %cst_41 {dimension_numbers = #tpu.dot_dimension_numbers<[1], [0], [0], [1], [0, 0, 1, 1], [], []>} : vector<16x8xf32>, vector<8x32xf32>, vector<16x32xf32> -> vector<16x32xf32>
    %49 = arith.addf %8, %48 : vector<16x32xf32>
    %c0_42 = arith.constant 0 : index
    %c1_43 = arith.constant 1 : index
    %c0_44 = arith.constant 0 : index
    %c0_45 = arith.constant 0 : index
    %50 = vector.load %arg4[%c0_42, %c1_43, %c0_44, %c0_45] : memref<3x4x32x8xf32, #tpu.memory_space<vmem>>, vector<1x1x32x8xf32>
    %51 = vector.shape_cast %50 : vector<1x1x32x8xf32> to vector<32x8xf32>
    %cst_46 = arith.constant dense<0.000000e+00> : vector<16x8xf32>
    %52 = tpu.matmul %1, %51, %cst_46 {dimension_numbers = #tpu.dot_dimension_numbers<[1], [0], [0], [1], [0, 0, 1, 1], [], []>} : vector<16x32xf32>, vector<32x8xf32>, vector<16x8xf32> -> vector<16x8xf32>
    %c0_47 = arith.constant 0 : index
    %c1_48 = arith.constant 1 : index
    %c0_49 = arith.constant 0 : index
    %c0_50 = arith.constant 0 : index
    %53 = vector.load %arg5[%c0_47, %c1_48, %c0_49, %c0_50] : memref<3x4x1x8xf32, #tpu.memory_space<vmem>>, vector<1x1x1x8xf32>
    %54 = vector.shape_cast %53 : vector<1x1x1x8xf32> to vector<1x8xf32>
    %55 = vector.broadcast %54 : vector<1x8xf32> to vector<16x8xf32>
    %56 = arith.addf %52, %55 : vector<16x8xf32>
    %c1_51 = arith.constant 1 : index
    %c1_52 = arith.constant 1 : index
    %c0_53 = arith.constant 0 : index
    %c0_54 = arith.constant 0 : index
    %57 = vector.load %arg4[%c1_51, %c1_52, %c0_53, %c0_54] : memref<3x4x32x8xf32, #tpu.memory_space<vmem>>, vector<1x1x32x8xf32>
    %58 = vector.shape_cast %57 : vector<1x1x32x8xf32> to vector<32x8xf32>
    %cst_55 = arith.constant dense<0.000000e+00> : vector<16x8xf32>
    %59 = tpu.matmul %3, %58, %cst_55 {dimension_numbers = #tpu.dot_dimension_numbers<[1], [0], [0], [1], [0, 0, 1, 1], [], []>} : vector<16x32xf32>, vector<32x8xf32>, vector<16x8xf32> -> vector<16x8xf32>
    %c1_56 = arith.constant 1 : index
    %c1_57 = arith.constant 1 : index
    %c0_58 = arith.constant 0 : index
    %c0_59 = arith.constant 0 : index
    %60 = vector.load %arg5[%c1_56, %c1_57, %c0_58, %c0_59] : memref<3x4x1x8xf32, #tpu.memory_space<vmem>>, vector<1x1x1x8xf32>
    %61 = vector.shape_cast %60 : vector<1x1x1x8xf32> to vector<1x8xf32>
    %62 = vector.broadcast %61 : vector<1x8xf32> to vector<16x8xf32>
    %63 = arith.addf %59, %62 : vector<16x8xf32>
    %c2_60 = arith.constant 2 : index
    %c1_61 = arith.constant 1 : index
    %c0_62 = arith.constant 0 : index
    %c0_63 = arith.constant 0 : index
    %64 = vector.load %arg4[%c2_60, %c1_61, %c0_62, %c0_63] : memref<3x4x32x8xf32, #tpu.memory_space<vmem>>, vector<1x1x32x8xf32>
    %65 = vector.shape_cast %64 : vector<1x1x32x8xf32> to vector<32x8xf32>
    %cst_64 = arith.constant dense<0.000000e+00> : vector<16x8xf32>
    %66 = tpu.matmul %5, %65, %cst_64 {dimension_numbers = #tpu.dot_dimension_numbers<[1], [0], [0], [1], [0, 0, 1, 1], [], []>} : vector<16x32xf32>, vector<32x8xf32>, vector<16x8xf32> -> vector<16x8xf32>
    %c2_65 = arith.constant 2 : index
    %c1_66 = arith.constant 1 : index
    %c0_67 = arith.constant 0 : index
    %c0_68 = arith.constant 0 : index
    %67 = vector.load %arg5[%c2_65, %c1_66, %c0_67, %c0_68] : memref<3x4x1x8xf32, #tpu.memory_space<vmem>>, vector<1x1x1x8xf32>
    %68 = vector.shape_cast %67 : vector<1x1x1x8xf32> to vector<1x8xf32>
    %69 = vector.broadcast %68 : vector<1x8xf32> to vector<16x8xf32>
    %70 = arith.addf %66, %69 : vector<16x8xf32>
    %71 = vector.shape_cast %56 : vector<16x8xf32> to vector<2x8x8xf32>
    %72 = vector.shape_cast %63 : vector<16x8xf32> to vector<2x8x8xf32>
    %73 = vector.shape_cast %70 : vector<16x8xf32> to vector<2x8x8xf32>
    "tpu.trace_start"() <{level = 10 : i32, message = "bqd,bkd->bqk"}> : () -> ()
    %cst_69 = arith.constant dense<0.000000e+00> : vector<2x8x8xf32>
    %74 = tpu.matmul %71, %72, %cst_69 {dimension_numbers = #tpu.dot_dimension_numbers<[2], [2], [1], [1], [0, 0, 0, 1, 1, 1], [0], [0]>} : vector<2x8x8xf32>, vector<2x8x8xf32>, vector<2x8x8xf32> -> vector<2x8x8xf32>
    "tpu.trace_stop"() : () -> ()
    %cst_70 = arith.constant dense<0xFF800000> : vector<2x8xf32>
    %75 = vector.multi_reduction <maximumf>, %74, %cst_70 [2] : vector<2x8x8xf32> to vector<2x8xf32>
    %76 = vector.shape_cast %75 : vector<2x8xf32> to vector<2x8x1xf32>
    %77 = vector.broadcast %76 : vector<2x8x1xf32> to vector<2x8x8xf32>
    %78 = arith.subf %74, %77 : vector<2x8x8xf32>
    %79 = math.exp %78 : vector<2x8x8xf32>
    %cst_71 = arith.constant dense<0.000000e+00> : vector<2x8xf32>
    %80 = vector.multi_reduction <add>, %79, %cst_71 [2] : vector<2x8x8xf32> to vector<2x8xf32>
    %81 = vector.shape_cast %80 : vector<2x8xf32> to vector<2x8x1xf32>
    %82 = tpu.reciprocal %81 {approx = true} : vector<2x8x1xf32> -> vector<2x8x1xf32>
    %83 = vector.broadcast %82 : vector<2x8x1xf32> to vector<2x8x8xf32>
    %84 = arith.mulf %79, %83 : vector<2x8x8xf32>
    "tpu.trace_start"() <{level = 10 : i32, message = "bqk,bkd->bqd"}> : () -> ()
    %cst_72 = arith.constant dense<0.000000e+00> : vector<2x8x8xf32>
    %85 = tpu.matmul %84, %73, %cst_72 {dimension_numbers = #tpu.dot_dimension_numbers<[2], [1], [1], [2], [0, 0, 0, 1, 1, 2], [0], [0]>} : vector<2x8x8xf32>, vector<2x8x8xf32>, vector<2x8x8xf32> -> vector<2x8x8xf32>
    "tpu.trace_stop"() : () -> ()
    %86 = vector.shape_cast %85 : vector<2x8x8xf32> to vector<16x8xf32>
    %c1_73 = arith.constant 1 : index
    %c0_74 = arith.constant 0 : index
    %c0_75 = arith.constant 0 : index
    %87 = vector.load %arg6[%c1_73, %c0_74, %c0_75] : memref<4x8x32xf32, #tpu.memory_space<vmem>>, vector<1x8x32xf32>
    %88 = vector.shape_cast %87 : vector<1x8x32xf32> to vector<8x32xf32>
    %cst_76 = arith.constant dense<0.000000e+00> : vector<16x32xf32>
    %89 = tpu.matmul %86, %88, %cst_76 {dimension_numbers = #tpu.dot_dimension_numbers<[1], [0], [0], [1], [0, 0, 1, 1], [], []>} : vector<16x8xf32>, vector<8x32xf32>, vector<16x32xf32> -> vector<16x32xf32>
    %90 = arith.addf %49, %89 : vector<16x32xf32>
    %c0_77 = arith.constant 0 : index
    %c2_78 = arith.constant 2 : index
    %c0_79 = arith.constant 0 : index
    %c0_80 = arith.constant 0 : index
    %91 = vector.load %arg4[%c0_77, %c2_78, %c0_79, %c0_80] : memref<3x4x32x8xf32, #tpu.memory_space<vmem>>, vector<1x1x32x8xf32>
    %92 = vector.shape_cast %91 : vector<1x1x32x8xf32> to vector<32x8xf32>
    %cst_81 = arith.constant dense<0.000000e+00> : vector<16x8xf32>
    %93 = tpu.matmul %1, %92, %cst_81 {dimension_numbers = #tpu.dot_dimension_numbers<[1], [0], [0], [1], [0, 0, 1, 1], [], []>} : vector<16x32xf32>, vector<32x8xf32>, vector<16x8xf32> -> vector<16x8xf32>
    %c0_82 = arith.constant 0 : index
    %c2_83 = arith.constant 2 : index
    %c0_84 = arith.constant 0 : index
    %c0_85 = arith.constant 0 : index
    %94 = vector.load %arg5[%c0_82, %c2_83, %c0_84, %c0_85] : memref<3x4x1x8xf32, #tpu.memory_space<vmem>>, vector<1x1x1x8xf32>
    %95 = vector.shape_cast %94 : vector<1x1x1x8xf32> to vector<1x8xf32>
    %96 = vector.broadcast %95 : vector<1x8xf32> to vector<16x8xf32>
    %97 = arith.addf %93, %96 : vector<16x8xf32>
    %c1_86 = arith.constant 1 : index
    %c2_87 = arith.constant 2 : index
    %c0_88 = arith.constant 0 : index
    %c0_89 = arith.constant 0 : index
    %98 = vector.load %arg4[%c1_86, %c2_87, %c0_88, %c0_89] : memref<3x4x32x8xf32, #tpu.memory_space<vmem>>, vector<1x1x32x8xf32>
    %99 = vector.shape_cast %98 : vector<1x1x32x8xf32> to vector<32x8xf32>
    %cst_90 = arith.constant dense<0.000000e+00> : vector<16x8xf32>
    %100 = tpu.matmul %3, %99, %cst_90 {dimension_numbers = #tpu.dot_dimension_numbers<[1], [0], [0], [1], [0, 0, 1, 1], [], []>} : vector<16x32xf32>, vector<32x8xf32>, vector<16x8xf32> -> vector<16x8xf32>
    %c1_91 = arith.constant 1 : index
    %c2_92 = arith.constant 2 : index
    %c0_93 = arith.constant 0 : index
    %c0_94 = arith.constant 0 : index
    %101 = vector.load %arg5[%c1_91, %c2_92, %c0_93, %c0_94] : memref<3x4x1x8xf32, #tpu.memory_space<vmem>>, vector<1x1x1x8xf32>
    %102 = vector.shape_cast %101 : vector<1x1x1x8xf32> to vector<1x8xf32>
    %103 = vector.broadcast %102 : vector<1x8xf32> to vector<16x8xf32>
    %104 = arith.addf %100, %103 : vector<16x8xf32>
    %c2_95 = arith.constant 2 : index
    %c2_96 = arith.constant 2 : index
    %c0_97 = arith.constant 0 : index
    %c0_98 = arith.constant 0 : index
    %105 = vector.load %arg4[%c2_95, %c2_96, %c0_97, %c0_98] : memref<3x4x32x8xf32, #tpu.memory_space<vmem>>, vector<1x1x32x8xf32>
    %106 = vector.shape_cast %105 : vector<1x1x32x8xf32> to vector<32x8xf32>
    %cst_99 = arith.constant dense<0.000000e+00> : vector<16x8xf32>
    %107 = tpu.matmul %5, %106, %cst_99 {dimension_numbers = #tpu.dot_dimension_numbers<[1], [0], [0], [1], [0, 0, 1, 1], [], []>} : vector<16x32xf32>, vector<32x8xf32>, vector<16x8xf32> -> vector<16x8xf32>
    %c2_100 = arith.constant 2 : index
    %c2_101 = arith.constant 2 : index
    %c0_102 = arith.constant 0 : index
    %c0_103 = arith.constant 0 : index
    %108 = vector.load %arg5[%c2_100, %c2_101, %c0_102, %c0_103] : memref<3x4x1x8xf32, #tpu.memory_space<vmem>>, vector<1x1x1x8xf32>
    %109 = vector.shape_cast %108 : vector<1x1x1x8xf32> to vector<1x8xf32>
    %110 = vector.broadcast %109 : vector<1x8xf32> to vector<16x8xf32>
    %111 = arith.addf %107, %110 : vector<16x8xf32>
    %112 = vector.shape_cast %97 : vector<16x8xf32> to vector<2x8x8xf32>
    %113 = vector.shape_cast %104 : vector<16x8xf32> to vector<2x8x8xf32>
    %114 = vector.shape_cast %111 : vector<16x8xf32> to vector<2x8x8xf32>
    "tpu.trace_start"() <{level = 10 : i32, message = "bqd,bkd->bqk"}> : () -> ()
    %cst_104 = arith.constant dense<0.000000e+00> : vector<2x8x8xf32>
    %115 = tpu.matmul %112, %113, %cst_104 {dimension_numbers = #tpu.dot_dimension_numbers<[2], [2], [1], [1], [0, 0, 0, 1, 1, 1], [0], [0]>} : vector<2x8x8xf32>, vector<2x8x8xf32>, vector<2x8x8xf32> -> vector<2x8x8xf32>
    "tpu.trace_stop"() : () -> ()
    %cst_105 = arith.constant dense<0xFF800000> : vector<2x8xf32>
    %116 = vector.multi_reduction <maximumf>, %115, %cst_105 [2] : vector<2x8x8xf32> to vector<2x8xf32>
    %117 = vector.shape_cast %116 : vector<2x8xf32> to vector<2x8x1xf32>
    %118 = vector.broadcast %117 : vector<2x8x1xf32> to vector<2x8x8xf32>
    %119 = arith.subf %115, %118 : vector<2x8x8xf32>
    %120 = math.exp %119 : vector<2x8x8xf32>
    %cst_106 = arith.constant dense<0.000000e+00> : vector<2x8xf32>
    %121 = vector.multi_reduction <add>, %120, %cst_106 [2] : vector<2x8x8xf32> to vector<2x8xf32>
    %122 = vector.shape_cast %121 : vector<2x8xf32> to vector<2x8x1xf32>
    %123 = tpu.reciprocal %122 {approx = true} : vector<2x8x1xf32> -> vector<2x8x1xf32>
    %124 = vector.broadcast %123 : vector<2x8x1xf32> to vector<2x8x8xf32>
    %125 = arith.mulf %120, %124 : vector<2x8x8xf32>
    "tpu.trace_start"() <{level = 10 : i32, message = "bqk,bkd->bqd"}> : () -> ()
    %cst_107 = arith.constant dense<0.000000e+00> : vector<2x8x8xf32>
    %126 = tpu.matmul %125, %114, %cst_107 {dimension_numbers = #tpu.dot_dimension_numbers<[2], [1], [1], [2], [0, 0, 0, 1, 1, 2], [0], [0]>} : vector<2x8x8xf32>, vector<2x8x8xf32>, vector<2x8x8xf32> -> vector<2x8x8xf32>
    "tpu.trace_stop"() : () -> ()
    %127 = vector.shape_cast %126 : vector<2x8x8xf32> to vector<16x8xf32>
    %c2_108 = arith.constant 2 : index
    %c0_109 = arith.constant 0 : index
    %c0_110 = arith.constant 0 : index
    %128 = vector.load %arg6[%c2_108, %c0_109, %c0_110] : memref<4x8x32xf32, #tpu.memory_space<vmem>>, vector<1x8x32xf32>
    %129 = vector.shape_cast %128 : vector<1x8x32xf32> to vector<8x32xf32>
    %cst_111 = arith.constant dense<0.000000e+00> : vector<16x32xf32>
    %130 = tpu.matmul %127, %129, %cst_111 {dimension_numbers = #tpu.dot_dimension_numbers<[1], [0], [0], [1], [0, 0, 1, 1], [], []>} : vector<16x8xf32>, vector<8x32xf32>, vector<16x32xf32> -> vector<16x32xf32>
    %131 = arith.addf %90, %130 : vector<16x32xf32>
    %c0_112 = arith.constant 0 : index
    %c3 = arith.constant 3 : index
    %c0_113 = arith.constant 0 : index
    %c0_114 = arith.constant 0 : index
    %132 = vector.load %arg4[%c0_112, %c3, %c0_113, %c0_114] : memref<3x4x32x8xf32, #tpu.memory_space<vmem>>, vector<1x1x32x8xf32>
    %133 = vector.shape_cast %132 : vector<1x1x32x8xf32> to vector<32x8xf32>
    %cst_115 = arith.constant dense<0.000000e+00> : vector<16x8xf32>
    %134 = tpu.matmul %1, %133, %cst_115 {dimension_numbers = #tpu.dot_dimension_numbers<[1], [0], [0], [1], [0, 0, 1, 1], [], []>} : vector<16x32xf32>, vector<32x8xf32>, vector<16x8xf32> -> vector<16x8xf32>
    %c0_116 = arith.constant 0 : index
    %c3_117 = arith.constant 3 : index
    %c0_118 = arith.constant 0 : index
    %c0_119 = arith.constant 0 : index
    %135 = vector.load %arg5[%c0_116, %c3_117, %c0_118, %c0_119] : memref<3x4x1x8xf32, #tpu.memory_space<vmem>>, vector<1x1x1x8xf32>
    %136 = vector.shape_cast %135 : vector<1x1x1x8xf32> to vector<1x8xf32>
    %137 = vector.broadcast %136 : vector<1x8xf32> to vector<16x8xf32>
    %138 = arith.addf %134, %137 : vector<16x8xf32>
    %c1_120 = arith.constant 1 : index
    %c3_121 = arith.constant 3 : index
    %c0_122 = arith.constant 0 : index
    %c0_123 = arith.constant 0 : index
    %139 = vector.load %arg4[%c1_120, %c3_121, %c0_122, %c0_123] : memref<3x4x32x8xf32, #tpu.memory_space<vmem>>, vector<1x1x32x8xf32>
    %140 = vector.shape_cast %139 : vector<1x1x32x8xf32> to vector<32x8xf32>
    %cst_124 = arith.constant dense<0.000000e+00> : vector<16x8xf32>
    %141 = tpu.matmul %3, %140, %cst_124 {dimension_numbers = #tpu.dot_dimension_numbers<[1], [0], [0], [1], [0, 0, 1, 1], [], []>} : vector<16x32xf32>, vector<32x8xf32>, vector<16x8xf32> -> vector<16x8xf32>
    %c1_125 = arith.constant 1 : index
    %c3_126 = arith.constant 3 : index
    %c0_127 = arith.constant 0 : index
    %c0_128 = arith.constant 0 : index
    %142 = vector.load %arg5[%c1_125, %c3_126, %c0_127, %c0_128] : memref<3x4x1x8xf32, #tpu.memory_space<vmem>>, vector<1x1x1x8xf32>
    %143 = vector.shape_cast %142 : vector<1x1x1x8xf32> to vector<1x8xf32>
    %144 = vector.broadcast %143 : vector<1x8xf32> to vector<16x8xf32>
    %145 = arith.addf %141, %144 : vector<16x8xf32>
    %c2_129 = arith.constant 2 : index
    %c3_130 = arith.constant 3 : index
    %c0_131 = arith.constant 0 : index
    %c0_132 = arith.constant 0 : index
    %146 = vector.load %arg4[%c2_129, %c3_130, %c0_131, %c0_132] : memref<3x4x32x8xf32, #tpu.memory_space<vmem>>, vector<1x1x32x8xf32>
    %147 = vector.shape_cast %146 : vector<1x1x32x8xf32> to vector<32x8xf32>
    %cst_133 = arith.constant dense<0.000000e+00> : vector<16x8xf32>
    %148 = tpu.matmul %5, %147, %cst_133 {dimension_numbers = #tpu.dot_dimension_numbers<[1], [0], [0], [1], [0, 0, 1, 1], [], []>} : vector<16x32xf32>, vector<32x8xf32>, vector<16x8xf32> -> vector<16x8xf32>
    %c2_134 = arith.constant 2 : index
    %c3_135 = arith.constant 3 : index
    %c0_136 = arith.constant 0 : index
    %c0_137 = arith.constant 0 : index
    %149 = vector.load %arg5[%c2_134, %c3_135, %c0_136, %c0_137] : memref<3x4x1x8xf32, #tpu.memory_space<vmem>>, vector<1x1x1x8xf32>
    %150 = vector.shape_cast %149 : vector<1x1x1x8xf32> to vector<1x8xf32>
    %151 = vector.broadcast %150 : vector<1x8xf32> to vector<16x8xf32>
    %152 = arith.addf %148, %151 : vector<16x8xf32>
    %153 = vector.shape_cast %138 : vector<16x8xf32> to vector<2x8x8xf32>
    %154 = vector.shape_cast %145 : vector<16x8xf32> to vector<2x8x8xf32>
    %155 = vector.shape_cast %152 : vector<16x8xf32> to vector<2x8x8xf32>
    "tpu.trace_start"() <{level = 10 : i32, message = "bqd,bkd->bqk"}> : () -> ()
    %cst_138 = arith.constant dense<0.000000e+00> : vector<2x8x8xf32>
    %156 = tpu.matmul %153, %154, %cst_138 {dimension_numbers = #tpu.dot_dimension_numbers<[2], [2], [1], [1], [0, 0, 0, 1, 1, 1], [0], [0]>} : vector<2x8x8xf32>, vector<2x8x8xf32>, vector<2x8x8xf32> -> vector<2x8x8xf32>
    "tpu.trace_stop"() : () -> ()
    %cst_139 = arith.constant dense<0xFF800000> : vector<2x8xf32>
    %157 = vector.multi_reduction <maximumf>, %156, %cst_139 [2] : vector<2x8x8xf32> to vector<2x8xf32>
    %158 = vector.shape_cast %157 : vector<2x8xf32> to vector<2x8x1xf32>
    %159 = vector.broadcast %158 : vector<2x8x1xf32> to vector<2x8x8xf32>
    %160 = arith.subf %156, %159 : vector<2x8x8xf32>
    %161 = math.exp %160 : vector<2x8x8xf32>
    %cst_140 = arith.constant dense<0.000000e+00> : vector<2x8xf32>
    %162 = vector.multi_reduction <add>, %161, %cst_140 [2] : vector<2x8x8xf32> to vector<2x8xf32>
    %163 = vector.shape_cast %162 : vector<2x8xf32> to vector<2x8x1xf32>
    %164 = tpu.reciprocal %163 {approx = true} : vector<2x8x1xf32> -> vector<2x8x1xf32>
    %165 = vector.broadcast %164 : vector<2x8x1xf32> to vector<2x8x8xf32>
    %166 = arith.mulf %161, %165 : vector<2x8x8xf32>
    "tpu.trace_start"() <{level = 10 : i32, message = "bqk,bkd->bqd"}> : () -> ()
    %cst_141 = arith.constant dense<0.000000e+00> : vector<2x8x8xf32>
    %167 = tpu.matmul %166, %155, %cst_141 {dimension_numbers = #tpu.dot_dimension_numbers<[2], [1], [1], [2], [0, 0, 0, 1, 1, 2], [0], [0]>} : vector<2x8x8xf32>, vector<2x8x8xf32>, vector<2x8x8xf32> -> vector<2x8x8xf32>
    "tpu.trace_stop"() : () -> ()
    %168 = vector.shape_cast %167 : vector<2x8x8xf32> to vector<16x8xf32>
    %c3_142 = arith.constant 3 : index
    %c0_143 = arith.constant 0 : index
    %c0_144 = arith.constant 0 : index
    %169 = vector.load %arg6[%c3_142, %c0_143, %c0_144] : memref<4x8x32xf32, #tpu.memory_space<vmem>>, vector<1x8x32xf32>
    %170 = vector.shape_cast %169 : vector<1x8x32xf32> to vector<8x32xf32>
    %cst_145 = arith.constant dense<0.000000e+00> : vector<16x32xf32>
    %171 = tpu.matmul %168, %170, %cst_145 {dimension_numbers = #tpu.dot_dimension_numbers<[1], [0], [0], [1], [0, 0, 1, 1], [], []>} : vector<16x8xf32>, vector<8x32xf32>, vector<16x32xf32> -> vector<16x32xf32>
    %172 = arith.addf %131, %171 : vector<16x32xf32>
    %173 = vector.shape_cast %172 : vector<16x32xf32> to vector<2x8x32xf32>
    %174 = tpu.concatenate %173, %43, %84, %125, %166 in 2 : vector<2x8x32xf32>, vector<2x8x8xf32>, vector<2x8x8xf32>, vector<2x8x8xf32>, vector<2x8x8xf32> -> vector<2x8x64xf32>
    %c0_146 = arith.constant 0 : index
    %c0_147 = arith.constant 0 : index
    %c0_148 = arith.constant 0 : index
    %175 = vector.load %arg8[%c0_146, %c0_147, %c0_148] : memref<2x8x64xf32, #tpu.memory_space<vmem>>, vector<2x8x64xf32>
    tpu.vector_store %arg8[%c0_146, %c0_147, %c0_148], %174 {strides = array<i32>} : memref<2x8x64xf32, #tpu.memory_space<vmem>>, vector<2x8x64xf32>,
    return
  }
  func.func @transform_0(%arg0: i32) -> (i32, i32, i32) {
    %c0_i32 = arith.constant 0 : i32
    %c0_i32_0 = arith.constant 0 : i32
    %c0_i32_1 = arith.constant 0 : i32
    %c0_i32_2 = arith.constant 0 : i32
    return %c0_i32, %c0_i32_0, %c0_i32_1 : i32, i32, i32
  }
  func.func @transform_1(%arg0: i32) -> (i32, i32, i32) {
    %c0_i32 = arith.constant 0 : i32
    %c0_i32_0 = arith.constant 0 : i32
    %c0_i32_1 = arith.constant 0 : i32
    %c0_i32_2 = arith.constant 0 : i32
    return %c0_i32, %c0_i32_0, %c0_i32_1 : i32, i32, i32
  }
  func.func @transform_2(%arg0: i32) -> (i32, i32, i32) {
    %c0_i32 = arith.constant 0 : i32
    %c0_i32_0 = arith.constant 0 : i32
    %c0_i32_1 = arith.constant 0 : i32
    %c0_i32_2 = arith.constant 0 : i32
    return %c0_i32, %c0_i32_0, %c0_i32_1 : i32, i32, i32
  }
  func.func @transform_3(%arg0: i32) -> (i32, i32, i32, i32) {
    %c0_i32 = arith.constant 0 : i32
    %c0_i32_0 = arith.constant 0 : i32
    %c0_i32_1 = arith.constant 0 : i32
    %c0_i32_2 = arith.constant 0 : i32
    %c0_i32_3 = arith.constant 0 : i32
    return %c0_i32, %c0_i32_0, %c0_i32_1, %c0_i32_2 : i32, i32, i32, i32
  }
  func.func @transform_4(%arg0: i32) -> (i32, i32, i32, i32) {
    %c0_i32 = arith.constant 0 : i32
    %c0_i32_0 = arith.constant 0 : i32
    %c0_i32_1 = arith.constant 0 : i32
    %c0_i32_2 = arith.constant 0 : i32
    %c0_i32_3 = arith.constant 0 : i32
    return %c0_i32, %c0_i32_0, %c0_i32_1, %c0_i32_2 : i32, i32, i32, i32
  }
  func.func @transform_5(%arg0: i32) -> (i32, i32, i32) {
    %c0_i32 = arith.constant 0 : i32
    %c0_i32_0 = arith.constant 0 : i32
    %c0_i32_1 = arith.constant 0 : i32
    %c0_i32_2 = arith.constant 0 : i32
    return %c0_i32, %c0_i32_0, %c0_i32_1 : i32, i32, i32
  }
  func.func @transform_6(%arg0: i32) -> (i32, i32) {
    %c0_i32 = arith.constant 0 : i32
    %c0_i32_0 = arith.constant 0 : i32
    %c0_i32_1 = arith.constant 0 : i32
    return %c0_i32, %c0_i32_0 : i32, i32
  }
  func.func @transform_7(%arg0: i32) -> (i32, i32, i32) {
    %c0_i32 = arith.constant 0 : i32
    %c0_i32_0 = arith.constant 0 : i32
    %c0_i32_1 = arith.constant 0 : i32
    %c0_i32_2 = arith.constant 0 : i32
    return %c0_i32, %c0_i32_0, %c0_i32_1 : i32, i32, i32
  }
}

</mosaic_0001>

<bundles_post_ra>
// kernel: multi_head_attention.1
= control target key start
LH: loop header
LB: loop body
LE: loop exit
PB: predicated region body
PF: predicated region fallthrough
CT: control target
= control target key end

     0   :  { %vm50_vm0 = vcmask 261120   ;;  %v3391_v16 = vmov 0.0   ;;  %vm3392_vm1 = vmmov 0   ;;  %vm320_vm2 = vcmask 64512   ;;  %s3394_s10 = smov 40   ;;  %s3395_s11 = smov 48   ;;  %s3838_s3 = inlined_call_operand.vmem [shape: f32[3,4,32,8], index: 3, kind: input, shape index: {}]   ;;  %s3839_s1 = inlined_call_operand.vmem [shape: f32[2,8,32], index: 1, kind: input, shape index: {}]   ;;  %s3840_s0 = inlined_call_operand.vmem [shape: f32[2,8,32], index: 0, kind: input, shape index: {}]   ;;  %s3841_s4 = inlined_call_operand.vmem [shape: f32[3,4,1,8], index: 4, kind: input, shape index: {}]   ;;  %s3842_s2 = inlined_call_operand.vmem [shape: f32[2,8,32], index: 2, kind: input, shape index: {}]   ;;  %s3843_s5 = inlined_call_operand.vmem [shape: f32[4,8,32], index: 5, kind: input, shape index: {}]   ;;  %s3844_s6 = inlined_call_operand.vmem [shape: f32[1,32], index: 6, kind: input, shape index: {}]   ;;  %s3845_s7 = inlined_call_operand.vmem [shape: f32[2,8,64], index: 7, kind: output, shape index: {}]  }
   0x1   :  { %v2778_v0 = vld [vmem:[%s3838_s3 + $0x80] sm:$0xff]  ;;  %v2779_v1 = vld [vmem:[%s3838_s3 + $0x88] sm:$0xff]  ;;  %v2780_v5 = vld [vmem:[%s3838_s3 + $0x90] sm:$0xff]  ;;  %vm2758_vm3 = vcmask 326656   ;;  %vm2761_vm4 = vcmask 392192   ;;  %vm2764_vm5 = vcmask 457728  }
   0x2   :  { %v39_v2 = vld [vmem:[%s3838_s3] sm:$0xff]  ;;  %v3257_v3 = vpack.c.bf16 %v2779_v1, %v2778_v0  ;;  %v40_v4 = vld [vmem:[%s3838_s3 + $0x8] sm:$0xff]  ;;  %v2781_v6 = vld [vmem:[%s3838_s3 + $0x98] sm:$0xff]  ;;  %vm2767_vm6 = vcmask 523264  }
   0x3   :  { %v3249_v7 = vpack.c.bf16 %v40_v4, %v39_v2  ;;  %v3261_v8 = vpack.c.bf16 %v2781_v6, %v2780_v5  ;;  %v41_v9 = vld [vmem:[%s3838_s3 + $0x10] sm:$0xff]  ;;  %v42_v10 = vld [vmem:[%s3838_s3 + $0x18] sm:$0xff]  ;;  %v3464_v11 = vld [vmem:[%s3839_s1] sm:$0xff] }
   0x4   :  { %3258 = vmatprep.subr.bf16.mxu1 %v3257_v3  ;;  %v3253_v12 = vpack.c.bf16 %v42_v10, %v41_v9  ;;  %3036 = vmatprep.mubr.msk.f32.mxu1 %vm50_vm0, %v3464_v11  ;;  %v3471_v13 = vld [vmem:[%s3840_s0] sm:$0xff]  ;;  %v3478_v14 = vld [vmem:[%s3839_s1 + $0x8] sm:$0xff]  ;;  %v2788_v29 = vld [vmem:[%s3838_s3 + $0x110] sm:$0xff] }
   0x5   :  { %3260 = vmatpush3.bf16.msra.mxu1 %v3257_v3  ;;  %3250 = vmatprep.subr.bf16.mxu0 %v3249_v7  ;;  %v3483_v15 = vld [vmem:[%s3840_s0 + $0x8] sm:$0xff]  ;;  %v2783_v17 = vld [vmem:[%s3841_s4 + $0x4] ss:$0 sm:$0xff]  ;;  %v2775_v19 = vld [vmem:[%s3841_s4] ss:$0 sm:$0xff] }
   0x6   :  { %3252 = vmatpush3.bf16.msra.mxu0 %v3249_v7  ;;  %3262 = vmatprep.subr.bf16.mxu1 %v3261_v8  ;;  %v2786_v27 = vld [vmem:[%s3838_s3 + $0x100] sm:$0xff]  ;;  %v2787_v28 = vld [vmem:[%s3838_s3 + $0x108] sm:$0xff]  ;;  %v2789_v31 = vld [vmem:[%s3838_s3 + $0x118] sm:$0xff] }
   0x7   :  { %3254 = vmatprep.subr.bf16.mxu0 %v3253_v12  ;;  %3025 = vmatprep.mubr.msk.f32.mxu0 %vm50_vm0, %v3471_v13  ;;  %v3265_v30 = vpack.c.bf16 %v2787_v28, %v2786_v27  ;;  %v3523_v32 = vld [vmem:[%s3842_s2] sm:$0xff]  ;;  %v3269_v33 = vpack.c.bf16 %v2789_v31, %v2788_v29  ;;  %v3530_v34 = vld [vmem:[%s3842_s2 + $0x8] sm:$0xff]  ;;  %v2804_v5 = vld [vmem:[%s3838_s3 + $0x30] sm:$0xff] }
   0x8   :  { %v2791_v52 = vld [vmem:[%s3841_s4 + $0x8] ss:$0 sm:$0xff]  ;;  %v641_v62 = vld [vmem:[%s3843_s5] sm:$0xff]  ;;  %v2805_v6 = vld [vmem:[%s3838_s3 + $0x38] sm:$0xff] }
   0x9   :  { %3264 = vmatpush3.bf16.msra.mxu1 %v3261_v8  ;;  %v2810_v63 = vld [vmem:[%s3838_s3 + $0xa0] sm:$0xff]  ;;  %v2811_v0 = vld [vmem:[%s3838_s3 + $0xa8] sm:$0xff]  ;;  %v3277_v7 = vpack.c.bf16 %v2805_v6, %v2804_v5  ;;  %v2812_v9 = vld [vmem:[%s3838_s3 + $0xb0] sm:$0xff] }
   0xa   :  { %3256 = vmatpush3.bf16.msra.mxu0 %v3253_v12  ;;  %3050 = vmatprep.subr.mxu1 %v3391_v16  ;;  %v3281_v1 = vpack.c.bf16 %v2811_v0, %v2810_v63  ;;  %v2802_v2 = vld [vmem:[%s3838_s3 + $0x20] sm:$0xff]  ;;  %v2803_v3 = vld [vmem:[%s3838_s3 + $0x28] sm:$0xff]  ;;  %v2813_v10 = vld [vmem:[%s3838_s3 + $0xb8] sm:$0xff] }
   0xb   :  { %3266 = vmatprep.subr.bf16.mxu0 %v3265_v30  ;;  %v3273_v4 = vpack.c.bf16 %v2803_v3, %v2802_v2  ;;  %v2819_v31 = vld [vmem:[%s3838_s3 + $0x128] sm:$0xff] }
   0xc   :  { %3037 = vmatmul.mubr.msk.f32.vlgmr.msra.gmra.mrb[0].mxu1 %vm50_vm0, %v3478_v14  ;;  %v2832_v3 = vld [vmem:[%s3843_s5 + $0x8] sm:$0xff] }
   0xd   :  { %3026 = vmatmul.mubr.msk.f32.vlgmr.msra.gmra.mrb[0].mxu0 %vm50_vm0, %v3483_v15  ;;  %3052 = vmatprep.mubr.msk.f32.mxu1 %vm3392_vm1, %v3391_v16  ;;  %v2844_v5 = vld [vmem:[%s3838_s3 + $0xc8] sm:$0xff] }
   0xe   :  { %3047 = vmatprep.mubr.msk.f32.mxu0 %vm50_vm0, %v3523_v32  ;;  %3268 = vmatpush3.bf16.msra.mxu0 %v3265_v30  ;;  %v2818_v30 = vld [vmem:[%s3838_s3 + $0x120] sm:$0xff] }
   0xf   :  { %3270 = vmatprep.subr.bf16.mxu0 %v3269_v33 }
  0x12   :  { %3272 = vmatpush3.bf16.msra.mxu0 %v3269_v33  ;;  %v2820_v33 = vld [vmem:[%s3838_s3 + $0x130] sm:$0xff] }
  0x13   :  { %3070 = vmatprep.subr.mxu0 %v641_v62 }
  0x15   :  { %3048 = vmatmul.mubr.msk.f32.vlgmr.msra.gmra.mrb[2].mxu0 %vm50_vm0, %v3530_v34 }
  0x16   :  { %3071 = vmatpush3.msra.mxu0 %v641_v62 }
  0x17   :  { %3282 = vmatprep.subr.bf16.mxu0 %v3281_v1 }
  0xdf   :  { %v3038_v18 = vpop.f32.mrb[0].mxu1 }
  0xe0   :  { %v217_v20 = vpop.f32.mrb[1].mxu1  ;;  %v3027_v21 = vpop.f32.mrb[0].mxu0  ;;  %v223_v25 = vadd.f32 %v3038_v18, %v2783_v17 }
  0xe1   :  { %v218_v22 = vadd.f32 %v2783_v17, %v217_v20  ;;  %v123_v23 = vpop.f32.mrb[1].mxu0  ;;  %v129_v26 = vadd.f32 %v3027_v21, %v2775_v19  ;;  %v3285_v17 = vpack.c.bf16 %v2813_v10, %v2812_v9  ;;  %v2837_v10 = vld [vmem:[%s3838_s3 + $0x50] sm:$0xff] }
  0xe2   :  { %v124_v24 = vadd.f32 %v2775_v19, %v123_v23 }
  0xe3   :  { %3051 = vmatpush3.xpose.msk.msra.mxu1 %vm320_vm2, %v218_v22  ;;  %v2815_v22 = vld [vmem:[%s3841_s4 + $0x5] ss:$0 sm:$0xff] }
  0xe4   :  { %3055 = vmatprep.subr.mxu1 %v3391_v16 }
  0xe6   :  { %3053 = vmatmul.mubr.msk.f32.vlgmr.msra.gmra.mrb[2].mxu1 %vm320_vm2, %v124_v24  ;;  %v2807_v24 = vld [vmem:[%s3841_s4 + $0x1] ss:$0 sm:$0xff] }
  0xe7   :  { %3056 = vmatpush3.xpose.msk.msra.mxu1 %vm320_vm2, %v223_v25  ;;  %3057 = vmatprep.mubr.msk.f32.mxu1 %vm3392_vm1, %v3391_v16 }
  0xe8   :  { %3060 = vmatprep.subr.mxu1 %v3391_v16  ;;  %v3049_v51 = vpop.f32.mrb[2].mxu0 }
  0xe9   :  { %v311_v53 = vpop.f32.mrb[3].mxu0  ;;  %v317_v54 = vadd.f32 %v3049_v51, %v2791_v52 }
  0xea   :  { %3058 = vmatmul.mubr.msk.f32.vlgmr.msra.gmra.mrb[4].mxu1 %vm320_vm2, %v129_v26  ;;  %v312_v55 = vadd.f32 %v2791_v52, %v311_v53 }
  0xeb   :  { %3062 = vmatprep.mubr.msk.f32.mxu1 %vm3392_vm1, %v3391_v16 }
  0xec   :  { %3061 = vmatpush3.msra.mxu1 %v312_v55  ;;  %v2823_v55 = vld [vmem:[%s3841_s4 + $0x9] ss:$0 sm:$0xff] }
  0xed   :  { %3065 = vmatprep.subr.mxu1 %v3391_v16 }
 0x1b9   :  { %v393_v35 = vpop.f32.mrb[2].mxu1 }
 0x1ba   :  { %v3054_v36 = vpop.f32.mrb[3].mxu1  ;;  %v473_v37 = vsel %vm320_vm2, %v393_v35, -inf }
 0x1bb   :  { %474 = vmax.xlane.f32.xlu0 %v473_v37  ;;  %v2821_v36 = vld [vmem:[%s3838_s3 + $0x138] sm:$0xff] }
 0x1bc   :  { %v3293_v37 = vpack.c.bf16 %v2821_v36, %v2820_v33 }
 0x1bd   :  { %v469_v38 = vpop.f32.mrb[4].mxu1 }
 0x1be   :  { %v3059_v39 = vpop.f32.mrb[5].mxu1  ;;  %v476_v40 = vsel %vm320_vm2, %v469_v38, -inf }
 0x1bf   :  { %477 = vmax.xlane.f32.xlu0 %v476_v40 }
 0x248   :  { %v475_v41 = vpop.xlane.xlu0 %474 }
 0x249   :  { %v479_v42 = vsub.f32 %v393_v35, %v475_v41  ;;  %v3289_v35 = vpack.c.bf16 %v2819_v31, %v2818_v30 }
 0x24b   :  { %v481_v43 = vmul.f32 1.442695, %v479_v42 }
 0x24c   :  { %v478_v44 = vpop.xlane.xlu0 %477 }
 0x24d   :  { %3359 = vpow2.f32 %v481_v43  ;;  %v480_v45 = vsub.f32 %v469_v38, %v478_v44 }
 0x24f   :  { %v483_v46 = vmul.f32 1.442695, %v480_v45 }
 0x251   :  { %3361 = vpow2.f32 %v483_v46 }
 0x257   :  { %v3360_v47 = vpop.eup %3359 }
 0x258   :  { %v485_v48 = vsel %vm320_vm2, %v3360_v47, 0.0 }
 0x259   :  { %486 = vadd.xlane.f32.xlu1 %v485_v48 }
 0x25b   :  { %v3362_v49 = vpop.eup %3361 }
 0x25c   :  { %v488_v50 = vsel %vm320_vm2, %v3362_v49, 0.0 }
 0x25d   :  { %489 = vadd.xlane.f32.xlu1 %v488_v50 }
 0x2e6   :  { %v487_v56 = vpop.xlane.xlu1 %486 }
 0x2e7   :  { %3363 = vrcp.f32 %v487_v56 }
 0x2ea   :  { %v490_v57 = vpop.xlane.xlu1 %489 }
 0x2eb   :  { %3365 = vrcp.f32 %v490_v57 }
 0x2f1   :  { %v3364_v58 = vpop.eup %3363 }
 0x2f2   :  { %v3542_v59 = vmul.f32 %v3364_v58, %v3360_v47 }
 0x2f4   :  { %3063 = vmatmul.mubr.msk.f32.vlgmr.msra.gmra.mrb[6].mxu1 %vm320_vm2, %v3542_v59 }
 0x2f5   :  { %v3366_v60 = vpop.eup %3365  ;;  %3066 = vmatpush3.msra.mxu1 %v317_v54  ;;  %3067 = vmatprep.mubr.msk.f32.mxu1 %vm3392_vm1, %v3391_v16 }
 0x2f6   :  { %v3548_v61 = vmul.f32 %v3366_v60, %v3362_v49  ;;  %3274 = vmatprep.subr.bf16.mxu1 %v3273_v4 }
 0x2f8   :  { %3068 = vmatmul.mubr.msk.f32.vlgmr.msra.gmra.mrb[8].mxu1 %vm320_vm2, %v3548_v61 }
 0x2f9   :  { %3083 = vmatprep.mubr.msk.f32.mxu1 %vm50_vm0, %v3471_v13  ;;  %3276 = vmatpush3.bf16.msra.mxu1 %v3273_v4  ;;  %v2843_v4 = vld [vmem:[%s3838_s3 + $0xc0] sm:$0xff] }
 0x2fa   :  { %3278 = vmatprep.subr.bf16.mxu1 %v3277_v7  ;;  %v3305_v6 = vpack.c.bf16 %v2844_v5, %v2843_v4  ;;  %v2865_v4 = vld [vmem:[%s3843_s5 + $0x10] sm:$0xff] }
 0x2fd   :  { %3280 = vmatpush3.bf16.msra.mxu1 %v3277_v7  ;;  %v2835_v7 = vld [vmem:[%s3838_s3 + $0x40] sm:$0xff] }
 0x2fe   :  { %3290 = vmatprep.subr.bf16.mxu1 %v3289_v35 }
 0x300   :  { %3084 = vmatmul.mubr.msk.f32.vlgmr.msra.gmra.mrb[10].mxu1 %vm50_vm0, %v3483_v15 }
 0x301   :  { %3105 = vmatprep.mubr.msk.f32.mxu1 %vm50_vm0, %v3523_v32  ;;  %3292 = vmatpush3.bf16.msra.mxu1 %v3289_v35 }
 0x302   :  { %3294 = vmatprep.subr.bf16.mxu1 %v3293_v37 }
 0x305   :  { %3296 = vmatpush3.bf16.msra.mxu1 %v3293_v37  ;;  %v2848_v37 = vld [vmem:[%s3841_s4 + $0x6] ss:$0 sm:$0xff] }
 0x306   :  { %3118 = vmatprep.subr.mxu1 %v3391_v16 }
 0x308   :  { %3106 = vmatmul.mubr.msk.f32.vlgmr.msra.gmra.mrb[12].mxu1 %vm50_vm0, %v3530_v34 }
 0x309   :  { %3120 = vmatprep.mubr.msk.f32.mxu1 %vm3392_vm1, %v3391_v16 }
 0x3c7   :  { %v564_v8 = vpop.f32.mrb[6].mxu1 }
 0x3c8   :  { %v3064_v12 = vpop.f32.mrb[7].mxu1  ;;  %3072 = vmatprep.mubr.msk.f32.mxu0 %vm320_vm2, %v564_v8  ;;  %v2836_v8 = vld [vmem:[%s3838_s3 + $0x48] sm:$0xff] }
 0x3c9   :  { %v3297_v9 = vpack.c.bf16 %v2836_v8, %v2835_v7  ;;  %v2838_v12 = vld [vmem:[%s3838_s3 + $0x58] sm:$0xff] }
 0x3cb   :  { %v637_v18 = vpop.f32.mrb[8].mxu1 }
 0x3cc   :  { %v3069_v19 = vpop.f32.mrb[9].mxu1  ;;  %3073 = vmatmul.mubr.msk.f32.vlgmr.msra.gmra.mrb[4].mxu0 %vm320_vm2, %v637_v18  ;;  %v2851_v18 = vld [vmem:[%s3838_s3 + $0x140] sm:$0xff] }
 0x3cd   :  { %3284 = vmatpush3.bf16.msra.mxu0 %v3281_v1  ;;  %3094 = vmatprep.mubr.msk.f32.mxu0 %vm50_vm0, %v3464_v11  ;;  %v2852_v19 = vld [vmem:[%s3838_s3 + $0x148] sm:$0xff] }
 0x3ce   :  { %3286 = vmatprep.subr.bf16.mxu0 %v3285_v17 }
 0x3d1   :  { %3288 = vmatpush3.bf16.msra.mxu0 %v3285_v17  ;;  %v3301_v17 = vpack.c.bf16 %v2838_v12, %v2837_v10  ;;  %v2876_v12 = vld [vmem:[%s3838_s3 + $0xe0] sm:$0xff] }
 0x3d2   :  { %3108 = vmatprep.subr.mxu0 %v3391_v16 }
 0x3d3   :  { %v3085_v20 = vpop.f32.mrb[10].mxu1 }
 0x3d4   :  { %3095 = vmatmul.mubr.msk.f32.vlgmr.msra.gmra.mrb[6].mxu0 %vm50_vm0, %v3478_v14  ;;  %v804_v21 = vpop.f32.mrb[11].mxu1  ;;  %v810_v29 = vadd.f32 %v3085_v20, %v2807_v24  ;;  %v2853_v20 = vld [vmem:[%s3838_s3 + $0x150] sm:$0xff] }
 0x3d5   :  { %3110 = vmatprep.mubr.msk.f32.mxu0 %vm3392_vm1, %v3391_v16  ;;  %v805_v27 = vadd.f32 %v2807_v24, %v804_v21  ;;  %v3313_v21 = vpack.c.bf16 %v2852_v19, %v2851_v18  ;;  %v2868_v19 = vld [vmem:[%s3838_s3 + $0x60] sm:$0xff] }
 0x3db   :  { %v3107_v54 = vpop.f32.mrb[12].mxu1 }
 0x3dc   :  { %v980_v56 = vpop.f32.mrb[13].mxu1  ;;  %v986_v58 = vadd.f32 %v3107_v54, %v2823_v55 }
 0x3dd   :  { %v981_v57 = vadd.f32 %v2823_v55, %v980_v56 }
 0x3df   :  { %3119 = vmatpush3.msra.mxu1 %v981_v57 }
 0x3e0   :  { %3298 = vmatprep.subr.bf16.mxu1 %v3297_v9 }
 0x4a7   :  { %v3096_v23 = vpop.f32.mrb[6].mxu0 }
 0x4a8   :  { %v892_v25 = vpop.f32.mrb[7].mxu0  ;;  %v898_v28 = vadd.f32 %v3096_v23, %v2815_v22 }
 0x4a9   :  { %v893_v26 = vadd.f32 %v2815_v22, %v892_v25  ;;  %v2854_v22 = vld [vmem:[%s3838_s3 + $0x158] sm:$0xff]  ;;  %v2845_v25 = vld [vmem:[%s3838_s3 + $0xd0] sm:$0xff] }
 0x4aa   :  { %v3317_v23 = vpack.c.bf16 %v2854_v22, %v2853_v20  ;;  %v2869_v20 = vld [vmem:[%s3838_s3 + $0x68] sm:$0xff]  ;;  %v2871_v22 = vld [vmem:[%s3838_s3 + $0x78] sm:$0xff] }
 0x4ab   :  { %3109 = vmatpush3.xpose.msk.msra.mxu0 %vm320_vm2, %v893_v26  ;;  %v2846_v26 = vld [vmem:[%s3838_s3 + $0xd8] sm:$0xff] }
 0x4ac   :  { %3113 = vmatprep.subr.mxu0 %v3391_v16 }
 0x4ae   :  { %3111 = vmatmul.mubr.msk.f32.vlgmr.msra.gmra.mrb[8].mxu0 %vm320_vm2, %v805_v27 }
 0x4af   :  { %3114 = vmatpush3.xpose.msk.msra.mxu0 %vm320_vm2, %v898_v28  ;;  %3115 = vmatprep.mubr.msk.f32.mxu0 %vm3392_vm1, %v3391_v16  ;;  %v3309_v28 = vpack.c.bf16 %v2846_v26, %v2845_v25  ;;  %v2879_v25 = vld [vmem:[%s3838_s3 + $0xf8] sm:$0xff] }
 0x4b0   :  { %3123 = vmatprep.subr.mxu0 %v3391_v16 }
 0x4b2   :  { %3116 = vmatmul.mubr.msk.f32.vlgmr.msra.gmra.mrb[10].mxu0 %vm320_vm2, %v810_v29 }
 0x4b3   :  { %3125 = vmatprep.mubr.msk.f32.mxu0 %vm3392_vm1, %v3391_v16  ;;  %3124 = vmatpush3.msra.mxu0 %v986_v58 }
 0x4b4   :  { %3128 = vmatprep.subr.mxu0 %v2832_v3 }
 0x581   :  { %v1061_v38 = vpop.f32.mrb[8].mxu0 }
 0x582   :  { %v3112_v39 = vpop.f32.mrb[9].mxu0  ;;  %v1141_v40 = vsel %vm320_vm2, %v1061_v38, -inf }
 0x583   :  { %1142 = vmax.xlane.f32.xlu0 %v1141_v40  ;;  %v2856_v40 = vld [vmem:[%s3841_s4 + $0xa] ss:$0 sm:$0xff] }
 0x585   :  { %v1137_v41 = vpop.f32.mrb[10].mxu0 }
 0x586   :  { %v3117_v42 = vpop.f32.mrb[11].mxu0  ;;  %v1144_v43 = vsel %vm320_vm2, %v1137_v41, -inf }
 0x587   :  { %1145 = vmax.xlane.f32.xlu1 %v1144_v43 }
 0x610   :  { %v1143_v44 = vpop.xlane.xlu0 %1142 }
 0x611   :  { %v1147_v45 = vsub.f32 %v1061_v38, %v1143_v44  ;;  %v2840_v38 = vld [vmem:[%s3841_s4 + $0x2] ss:$0 sm:$0xff] }
 0x613   :  { %v1149_v46 = vmul.f32 1.442695, %v1147_v45 }
 0x614   :  { %v1146_v47 = vpop.xlane.xlu1 %1145 }
 0x615   :  { %3367 = vpow2.f32 %v1149_v46  ;;  %v1148_v48 = vsub.f32 %v1137_v41, %v1146_v47 }
 0x617   :  { %v1151_v49 = vmul.f32 1.442695, %v1148_v48 }
 0x619   :  { %3369 = vpow2.f32 %v1151_v49 }
 0x61f   :  { %v3368_v50 = vpop.eup %3367 }
 0x620   :  { %v1153_v51 = vsel %vm320_vm2, %v3368_v50, 0.0 }
 0x621   :  { %1154 = vadd.xlane.f32.xlu0 %v1153_v51 }
 0x623   :  { %v3370_v52 = vpop.eup %3369 }
 0x624   :  { %v1156_v53 = vsel %vm320_vm2, %v3370_v52, 0.0 }
 0x625   :  { %1157 = vadd.xlane.f32.xlu1 %v1156_v53 }
 0x6ae   :  { %v1155_v60 = vpop.xlane.xlu0 %1154 }
 0x6af   :  { %3371 = vrcp.f32 %v1155_v60 }
 0x6b2   :  { %v1158_v62 = vpop.xlane.xlu1 %1157 }
 0x6b3   :  { %3373 = vrcp.f32 %v1158_v62 }
 0x6b9   :  { %v3372_v63 = vpop.eup %3371 }
 0x6ba   :  { %v3634_v0 = vmul.f32 %v3372_v63, %v3368_v50 }
 0x6bc   :  { %3121 = vmatmul.mubr.msk.f32.vlgmr.msra.gmra.mrb[14].mxu1 %vm320_vm2, %v3634_v0 }
 0x6bd   :  { %v3374_v1 = vpop.eup %3373  ;;  %3141 = vmatprep.mubr.msk.f32.mxu1 %vm50_vm0, %v3471_v13  ;;  %3300 = vmatpush3.bf16.msra.mxu1 %v3297_v9 }
 0x6be   :  { %v3640_v2 = vmul.f32 %v3374_v1, %v3370_v52  ;;  %3302 = vmatprep.subr.bf16.mxu1 %v3301_v17 }
 0x6c0   :  { %3126 = vmatmul.mubr.msk.f32.vlgmr.msra.gmra.mrb[12].mxu0 %vm320_vm2, %v3640_v2 }
 0x6c1   :  { %3129 = vmatpush3.msra.mxu0 %v2832_v3  ;;  %3304 = vmatpush3.bf16.msra.mxu1 %v3301_v17  ;;  %v2877_v17 = vld [vmem:[%s3838_s3 + $0xe8] sm:$0xff] }
 0x6c2   :  { %3306 = vmatprep.subr.bf16.mxu0 %v3305_v6  ;;  %3314 = vmatprep.subr.bf16.mxu1 %v3313_v21  ;;  %v3329_v18 = vpack.c.bf16 %v2877_v17, %v2876_v12 }
 0x6c4   :  { %3142 = vmatmul.mubr.msk.f32.vlgmr.msra.gmra.mrb[16].mxu1 %vm50_vm0, %v3483_v15 }
 0x6c5   :  { %3163 = vmatprep.mubr.msk.f32.mxu1 %vm50_vm0, %v3523_v32  ;;  %3316 = vmatpush3.bf16.msra.mxu1 %v3313_v21  ;;  %v2870_v21 = vld [vmem:[%s3838_s3 + $0x70] sm:$0xff] }
 0x6c6   :  { %3318 = vmatprep.subr.bf16.mxu1 %v3317_v23 }
 0x6c9   :  { %3320 = vmatpush3.bf16.msra.mxu1 %v3317_v23  ;;  %v3325_v23 = vpack.c.bf16 %v2871_v22, %v2870_v21 }
 0x6ca   :  { %3171 = vmatprep.subr.mxu1 %v3391_v16 }
 0x6cc   :  { %3164 = vmatmul.mubr.msk.f32.vlgmr.msra.gmra.mrb[18].mxu1 %vm50_vm0, %v3530_v34 }
 0x6cd   :  { %3173 = vmatprep.mubr.msk.f32.mxu1 %vm3392_vm1, %v3391_v16 }
 0x78f   :  { %v1232_v24 = vpop.f32.mrb[14].mxu1 }
 0x790   :  { %v3122_v27 = vpop.f32.mrb[15].mxu1  ;;  %3130 = vmatprep.mubr.msk.f32.mxu0 %vm320_vm2, %v1232_v24  ;;  %v2878_v24 = vld [vmem:[%s3838_s3 + $0xf0] sm:$0xff] }
 0x793   :  { %v1305_v29 = vpop.f32.mrb[12].mxu0 }
 0x794   :  { %v3127_v30 = vpop.f32.mrb[13].mxu0  ;;  %3131 = vmatmul.mubr.msk.f32.vlgmr.msra.gmra.mrb[4].mxu0 %vm320_vm2, %v1305_v29  ;;  %v3333_v29 = vpack.c.bf16 %v2879_v25, %v2878_v24 }
 0x795   :  { %3308 = vmatpush3.bf16.msra.mxu0 %v3305_v6  ;;  %3152 = vmatprep.mubr.msk.f32.mxu0 %vm50_vm0, %v3464_v11 }
 0x796   :  { %3310 = vmatprep.subr.bf16.mxu0 %v3309_v28 }
 0x797   :  { %v3143_v31 = vpop.f32.mrb[16].mxu1 }
 0x798   :  { %v1473_v33 = vpop.f32.mrb[17].mxu1  ;;  %v1479_v44 = vadd.f32 %v3143_v31, %v2840_v38  ;;  %v2881_v31 = vld [vmem:[%s3841_s4 + $0x7] ss:$0 sm:$0xff] }
 0x799   :  { %3312 = vmatpush3.bf16.msra.mxu0 %v3309_v28  ;;  %v1474_v45 = vadd.f32 %v2840_v38, %v1473_v33 }
 0x79a   :  { %3166 = vmatprep.subr.mxu0 %v3391_v16 }
 0x79c   :  { %3153 = vmatmul.mubr.msk.f32.vlgmr.msra.gmra.mrb[14].mxu0 %vm50_vm0, %v3478_v14 }
 0x79d   :  { %3168 = vmatprep.mubr.msk.f32.mxu0 %vm3392_vm1, %v3391_v16 }
 0x79f   :  { %v3165_v35 = vpop.f32.mrb[18].mxu1 }
 0x7a0   :  { %v1649_v36 = vpop.f32.mrb[19].mxu1  ;;  %v1655_v46 = vadd.f32 %v3165_v35, %v2856_v40 }
 0x7a1   :  { %v1650_v47 = vadd.f32 %v2856_v40, %v1649_v36  ;;  %v2885_v40 = vld [vmem:[%s3838_s3 + $0x168] sm:$0xff] }
 0x86f   :  { %v3154_v39 = vpop.f32.mrb[14].mxu0 }
 0x870   :  { %v1567_v41 = vadd.f32 %v3154_v39, %v2848_v37  ;;  %v1561_v42 = vpop.f32.mrb[15].mxu0  ;;  %v2884_v39 = vld [vmem:[%s3838_s3 + $0x160] sm:$0xff] }
 0x871   :  { %v1562_v43 = vadd.f32 %v2848_v37, %v1561_v42  ;;  %v3337_v42 = vpack.c.bf16 %v2885_v40, %v2884_v39 }
 0x872   :  { %3172 = vmatpush3.xpose.msk.msra.mxu1 %vm320_vm2, %v1567_v41  ;;  %v2886_v41 = vld [vmem:[%s3838_s3 + $0x170] sm:$0xff] }
 0x873   :  { %3167 = vmatpush3.xpose.msk.msra.mxu0 %vm320_vm2, %v1562_v43  ;;  %3181 = vmatprep.subr.mxu1 %v3391_v16  ;;  %v2887_v43 = vld [vmem:[%s3838_s3 + $0x178] sm:$0xff]  ;;  %s3393_s3 = smov 32  }
 0x874   :  { %3176 = vmatprep.subr.mxu0 %v3391_v16 }
 0x875   :  { %3174 = vmatmul.mubr.msk.f32.vlgmr.msra.gmra.mrb[20].mxu1 %vm320_vm2, %v1479_v44  ;;  %v3341_v44 = vpack.c.bf16 %v2887_v43, %v2886_v41 }
 0x876   :  { %3169 = vmatmul.mubr.msk.f32.vlgmr.msra.gmra.mrb[16].mxu0 %vm320_vm2, %v1474_v45  ;;  %3182 = vmatpush3.msra.mxu1 %v1655_v46 }
 0x877   :  { %3177 = vmatpush3.msra.mxu0 %v1650_v47  ;;  %3183 = vmatprep.mubr.msk.f32.mxu1 %vm3392_vm1, %v3391_v16 }
 0x878   :  { %3178 = vmatprep.mubr.msk.f32.mxu0 %vm3392_vm1, %v3391_v16  ;;  %3186 = vmatprep.subr.mxu0 %v2865_v4 }
 0x948   :  { %v1806_v48 = vpop.f32.mrb[20].mxu1 }
 0x949   :  { %v1730_v49 = vpop.f32.mrb[16].mxu0  ;;  %v3175_v50 = vpop.f32.mrb[21].mxu1  ;;  %v1813_v51 = vsel %vm320_vm2, %v1806_v48, -inf }
 0x94a   :  { %1814 = vmax.xlane.f32.xlu1 %v1813_v51  ;;  %v3170_v52 = vpop.f32.mrb[17].mxu0  ;;  %v1810_v53 = vsel %vm320_vm2, %v1730_v49, -inf }
 0x94b   :  { %1811 = vmax.xlane.f32.xlu0 %v1810_v53 }
 0x9d7   :  { %v1815_v54 = vpop.xlane.xlu1 %1814 }
 0x9d8   :  { %v1817_v55 = vsub.f32 %v1806_v48, %v1815_v54  ;;  %v1812_v56 = vpop.xlane.xlu0 %1811 }
 0x9d9   :  { %v1816_v57 = vsub.f32 %v1730_v49, %v1812_v56 }
 0x9da   :  { %v1820_v58 = vmul.f32 1.442695, %v1817_v55 }
 0x9db   :  { %v1818_v60 = vmul.f32 1.442695, %v1816_v57 }
 0x9dc   :  { %3375 = vpow2.f32 %v1820_v58 }
 0x9dd   :  { %3377 = vpow2.f32 %v1818_v60 }
 0x9e6   :  { %v3376_v62 = vpop.eup %3375 }
 0x9e7   :  { %v3378_v63 = vpop.eup %3377  ;;  %v1825_v1 = vsel %vm320_vm2, %v3376_v62, 0.0 }
 0x9e8   :  { %1826 = vadd.xlane.f32.xlu1 %v1825_v1  ;;  %v1822_v3 = vsel %vm320_vm2, %v3378_v63, 0.0 }
 0x9e9   :  { %1823 = vadd.xlane.f32.xlu0 %v1822_v3 }
 0xa75   :  { %v1827_v5 = vpop.xlane.xlu1 %1826 }
 0xa76   :  { %3379 = vrcp.f32 %v1827_v5  ;;  %v1824_v6 = vpop.xlane.xlu0 %1823 }
 0xa77   :  { %3381 = vrcp.f32 %v1824_v6 }
 0xa80   :  { %v3380_v7 = vpop.eup %3379 }
 0xa81   :  { %v3382_v8 = vpop.eup %3381  ;;  %v3727_v9 = vmul.f32 %v3380_v7, %v3376_v62  ;;  %v2889_v62 = vld [vmem:[%s3841_s4 + $0xb] ss:$0 sm:$0xff] }
 0xa82   :  { %v3729_v10 = vmul.f32 %v3382_v8, %v3378_v63 }
 0xa83   :  { %3184 = vmatmul.mubr.msk.f32.vlgmr.msra.gmra.mrb[22].mxu1 %vm320_vm2, %v3727_v9 }
 0xa84   :  { %3179 = vmatmul.mubr.msk.f32.vlgmr.msra.gmra.mrb[18].mxu0 %vm320_vm2, %v3729_v10  ;;  %3199 = vmatprep.mubr.msk.f32.mxu1 %vm50_vm0, %v3471_v13  ;;  %v3321_v13 = vpack.c.bf16 %v2869_v20, %v2868_v19  ;;  %v2774_v20 = vld [vmem:[%s3844_s6] ss:$0 sm:$0xff] }
 0xa85   :  { %3187 = vmatpush3.msra.mxu0 %v2865_v4 }
 0xa86   :  { %3330 = vmatprep.subr.bf16.mxu0 %v3329_v18  ;;  %3322 = vmatprep.subr.bf16.mxu1 %v3321_v13 }
 0xa87   :  { %3324 = vmatpush3.bf16.msra.mxu1 %v3321_v13 }
 0xa88   :  { %3326 = vmatprep.subr.bf16.mxu1 %v3325_v23 }
 0xa8b   :  { %3328 = vmatpush3.bf16.msra.mxu1 %v3325_v23 }
 0xa8c   :  { %3338 = vmatprep.subr.bf16.mxu1 %v3337_v42 }
 0xa8e   :  { %3200 = vmatmul.mubr.msk.f32.vlgmr.msra.gmra.mrb[24].mxu1 %vm50_vm0, %v3483_v15 }
 0xa8f   :  { %3221 = vmatprep.mubr.msk.f32.mxu1 %vm50_vm0, %v3523_v32  ;;  %3340 = vmatpush3.bf16.msra.mxu1 %v3337_v42 }
 0xa90   :  { %3342 = vmatprep.subr.bf16.mxu1 %v3341_v44 }
 0xa93   :  { %3344 = vmatpush3.bf16.msra.mxu1 %v3341_v44 }
 0xa94   :  { %3234 = vmatprep.subr.mxu1 %v3391_v16 }
 0xa96   :  { %3222 = vmatmul.mubr.msk.f32.vlgmr.msra.gmra.mrb[26].mxu1 %vm50_vm0, %v3530_v34 }
 0xa97   :  { %3236 = vmatprep.mubr.msk.f32.mxu1 %vm3392_vm1, %v3391_v16 }
 0xb56   :  { %v1974_v26 = vpop.f32.mrb[22].mxu1 }
 0xb57   :  { %v1901_v27 = vpop.f32.mrb[18].mxu0  ;;  %v3185_v28 = vpop.f32.mrb[23].mxu1 }
 0xb58   :  { %v3180_v30 = vpop.f32.mrb[19].mxu0  ;;  %3188 = vmatprep.mubr.msk.f32.mxu0 %vm320_vm2, %v1901_v27 }
 0xb59   :  { %3189 = vmatmul.mubr.msk.f32.vlgmr.msra.gmra.mrb[4].mxu0 %vm320_vm2, %v1974_v26 }
 0xb5a   :  { %3332 = vmatpush3.bf16.msra.mxu0 %v3329_v18  ;;  %3210 = vmatprep.mubr.msk.f32.mxu0 %vm50_vm0, %v3464_v11  ;;  %v2873_v11 = vld [vmem:[%s3841_s4 + $0x3] ss:$0 sm:$0xff]  ;;  %s3396_s4 = smov 56  }
 0xb5b   :  { %3334 = vmatprep.subr.bf16.mxu0 %v3333_v29 }
 0xb5e   :  { %3336 = vmatpush3.bf16.msra.mxu0 %v3333_v29 }
 0xb5f   :  { %3224 = vmatprep.subr.mxu0 %v3391_v16 }
 0xb61   :  { %3211 = vmatmul.mubr.msk.f32.vlgmr.msra.gmra.mrb[20].mxu0 %vm50_vm0, %v3478_v14  ;;  %v3201_v15 = vpop.f32.mrb[24].mxu1 }
 0xb62   :  { %3226 = vmatprep.mubr.msk.f32.mxu0 %vm3392_vm1, %v3391_v16  ;;  %v2142_v32 = vpop.f32.mrb[25].mxu1  ;;  %v2148_v38 = vadd.f32 %v3201_v15, %v2873_v11 }
 0xb63   :  { %v2143_v37 = vadd.f32 %v2873_v11, %v2142_v32 }
 0xb69   :  { %v3223_v60 = vpop.f32.mrb[26].mxu1 }
 0xb6a   :  { %v2324_v63 = vadd.f32 %v3223_v60, %v2889_v62  ;;  %v2318_v1 = vpop.f32.mrb[27].mxu1 }
 0xb6b   :  { %v2319_v3 = vadd.f32 %v2889_v62, %v2318_v1 }
 0xb6d   :  { %3235 = vmatpush3.msra.mxu1 %v2319_v3 }
 0xc34   :  { %v3212_v33 = vpop.f32.mrb[20].mxu0 }
 0xc35   :  { %v2230_v35 = vpop.f32.mrb[21].mxu0  ;;  %v2236_v14 = vadd.f32 %v3212_v33, %v2881_v31 }
 0xc36   :  { %v2231_v36 = vadd.f32 %v2881_v31, %v2230_v35 }
 0xc38   :  { %3225 = vmatpush3.xpose.msk.msra.mxu0 %vm320_vm2, %v2231_v36 }
 0xc39   :  { %3229 = vmatprep.subr.mxu0 %v3391_v16 }
 0xc3b   :  { %3227 = vmatmul.mubr.msk.f32.vlgmr.msra.gmra.mrb[22].mxu0 %vm320_vm2, %v2143_v37 }
 0xc3c   :  { %3230 = vmatpush3.xpose.msk.msra.mxu0 %vm320_vm2, %v2236_v14  ;;  %3231 = vmatprep.mubr.msk.f32.mxu0 %vm3392_vm1, %v3391_v16 }
 0xc3d   :  { %3239 = vmatprep.subr.mxu0 %v3391_v16 }
 0xc3f   :  { %3232 = vmatmul.mubr.msk.f32.vlgmr.msra.gmra.mrb[24].mxu0 %vm320_vm2, %v2148_v38 }
 0xc40   :  { %3241 = vmatprep.mubr.msk.f32.mxu0 %vm3392_vm1, %v3391_v16  ;;  %3240 = vmatpush3.msra.mxu0 %v2324_v63 }
 0xd0e   :  { %v2399_v45 = vpop.f32.mrb[22].mxu0 }
 0xd0f   :  { %v3228_v46 = vpop.f32.mrb[23].mxu0  ;;  %v2479_v47 = vsel %vm320_vm2, %v2399_v45, -inf }
 0xd10   :  { %2480 = vmax.xlane.f32.xlu0 %v2479_v47 }
 0xd12   :  { %v2475_v48 = vpop.f32.mrb[24].mxu0 }
 0xd13   :  { %v3233_v49 = vpop.f32.mrb[25].mxu0  ;;  %v2482_v50 = vsel %vm320_vm2, %v2475_v48, -inf }
 0xd14   :  { %2483 = vmax.xlane.f32.xlu1 %v2482_v50 }
 0xd9d   :  { %v2481_v51 = vpop.xlane.xlu0 %2480 }
 0xd9e   :  { %v2485_v52 = vsub.f32 %v2399_v45, %v2481_v51 }
 0xda0   :  { %v2487_v53 = vmul.f32 1.442695, %v2485_v52 }
 0xda1   :  { %v2484_v54 = vpop.xlane.xlu1 %2483 }
 0xda2   :  { %3383 = vpow2.f32 %v2487_v53  ;;  %v2486_v55 = vsub.f32 %v2475_v48, %v2484_v54 }
 0xda4   :  { %v2489_v34 = vmul.f32 1.442695, %v2486_v55 }
 0xda6   :  { %3385 = vpow2.f32 %v2489_v34 }
 0xdac   :  { %v3384_v56 = vpop.eup %3383 }
 0xdad   :  { %v2491_v16 = vsel %vm320_vm2, %v3384_v56, 0.0 }
 0xdae   :  { %2492 = vadd.xlane.f32.xlu0 %v2491_v16 }
 0xdb0   :  { %v3386_v57 = vpop.eup %3385 }
 0xdb1   :  { %v2494_v58 = vsel %vm320_vm2, %v3386_v57, 0.0 }
 0xdb2   :  { %2495 = vadd.xlane.f32.xlu1 %v2494_v58 }
 0xdc3   :  { %2734 = vrot.lane.b32.xlu1 %v3548_v61, %s3393_s3 }
 0xdc4   :  { %2732 = vrot.lane.b32.xlu0 %v3542_v59, %s3393_s3 }
 0xdc7   :  { %2738 = vrot.lane.b32.xlu1 %v3634_v0, %s3394_s10 }
 0xdc8   :  { %2744 = vrot.lane.b32.xlu0 %v3729_v10, %s3395_s11 }
 0xdcb   :  { %2740 = vrot.lane.b32.xlu1 %v3640_v2, %s3394_s10  ;;  %v2898_v2 = vld [vmem:[%s3843_s5 + $0x18] sm:$0xff] }
 0xdcc   :  { %3244 = vmatprep.subr.mxu0 %v2898_v2 }
 0xdcf   :  { %2746 = vrot.lane.b32.xlu1 %v3727_v9, %s3395_s11 }
 0xe3b   :  { %v2493_v61 = vpop.xlane.xlu0 %2492 }
 0xe3c   :  { %3387 = vrcp.f32 %v2493_v61 }
 0xe3f   :  { %v2496_v4 = vpop.xlane.xlu1 %2495  ;;  %v2733_v19 = vpop.permute.xlu0 %2732 }
 0xe40   :  { %3389 = vrcp.f32 %v2496_v4 }
 0xe43   :  { %v2735_v12 = vpop.permute.xlu1 %2734  ;;  %v2745_v24 = vpop.permute.xlu0 %2744 }
 0xe46   :  { %v3388_v59 = vpop.eup %3387 }
 0xe47   :  { %v2499_v5 = vmul.f32 %v3388_v59, %v3384_v56  ;;  %v2739_v17 = vpop.permute.xlu1 %2738 }
 0xe49   :  { %2750 = vrot.lane.b32.xlu0 %v2499_v5, %s3396_s4  ;;  %3237 = vmatmul.mubr.msk.f32.vlgmr.msra.gmra.mrb[28].mxu1 %vm320_vm2, %v2499_v5 }
 0xe4a   :  { %v3390_v6 = vpop.eup %3389 }
 0xe4b   :  { %v2500_v0 = vmul.f32 %v3390_v6, %v3386_v57  ;;  %v2741_v18 = vpop.permute.xlu1 %2740 }
 0xe4d   :  { %2752 = vrot.lane.b32.xlu1 %v2500_v0, %s3396_s4  ;;  %3242 = vmatmul.mubr.msk.f32.vlgmr.msra.gmra.mrb[26].mxu0 %vm320_vm2, %v2500_v0 }
 0xe4e   :  { %3245 = vmatpush3.msra.mxu0 %v2898_v2 }
 0xe4f   :  { %v2747_v21 = vpop.permute.xlu1 %2746 }
 0xebb   :  { %v2751_v32 = vpop.permute.xlu0 %2750 }
 0xebf   :  { %v2753_v29 = vpop.permute.xlu1 %2752 }
 0xf1c   :  { %v2570_v7 = vpop.f32.mrb[28].mxu1 }
 0xf1d   :  { %v3238_v8 = vpop.f32.mrb[29].mxu1  ;;  %3246 = vmatprep.mubr.msk.f32.mxu0 %vm320_vm2, %v2570_v7 }
 0xf20   :  { %v2643_v9 = vpop.f32.mrb[26].mxu0 }
 0xf21   :  { %v3243_v10 = vpop.f32.mrb[27].mxu0  ;;  %3247 = vmatmul.mubr.msk.f32.vlgmr.msra.gmra.mrb[4].mxu0 %vm320_vm2, %v2643_v9 }
 0xff4   :  { %v3248_v13 = vpop.f32.mrb[4].mxu0 }
 0xff5   :  { %v3345_v22 = vadd.f32 %v3248_v13, %v2774_v20  ;;  %v2721_v23 = vpop.f32.mrb[5].mxu0 }
 0xff6   :  { %v3346_v25 = vadd.f32 %v2774_v20, %v2721_v23 }
 0xff7   :  { %v2757_v26 = vsel %vm50_vm0, %v3345_v22, %v2735_v12 }
 0xff8   :  { %v2760_v27 = vsel %vm2758_vm3, %v2757_v26, %v2741_v18  ;;  %v2756_v28 = vsel %vm50_vm0, %v3346_v25, %v2733_v19 }
 0xff9   :  { %v2763_v30 = vsel %vm2761_vm4, %v2760_v27, %v2747_v21  ;;  %v2759_v15 = vsel %vm2758_vm3, %v2756_v28, %v2739_v17 }
 0xffa   :  { %v2766_v31 = vsel %vm2764_vm5, %v2763_v30, %v2753_v29  ;;  %v2762_v33 = vsel %vm2761_vm4, %v2759_v15, %v2745_v24 }
 0xffb   :  { %2769 = vst.msk [vmem:[%s3845_s7 + $0x8] sm:$0xff] %vm2767_vm6, %v2766_v31  ;;  %v2765_v11 = vsel %vm2764_vm5, %v2762_v33, %v2751_v32 }
 0xffc   :  { %2768 = vst.msk [vmem:[%s3845_s7] sm:$0xff] %vm2767_vm6, %v2765_v11 }

</bundles_post_ra>
